<compile_context>
chip_gen: v6e
topology: v6e:2x2x1
jax: 0.10.0
libtpu: 0.0.40
codegen_flags: <defaults>
</compile_context>

<pallas_src>
import jax
import jax.numpy as jnp
from jax.experimental import pallas as pl
from jax.experimental.pallas import tpu as pltpu

_LANES = 128


def _copy_kernel(x_ref, o_ref):
    # Whole-tile copy: one wide load + one wide, lane-dense (unmasked) store.
    o_ref[...] = x_ref[...]


def _sublane_multiple(dtype) -> int:
    # Minimum efficient second-minor tile: 8 for 4-byte, 16 for 2-byte,
    # 32 for 1-byte dtypes (packed vreg rows).
    itemsize = jnp.dtype(dtype).itemsize
    return max(8, 32 // max(1, itemsize))


def _choose_layout(n, sub, max_block_elems):
    """Pick (rows, cols, tile_rows, grid_rows) for a lane-dense tiled copy."""
    # Widest lane-dense row (multiple of 128) that divides n, capped so a
    # sublane-aligned strip of rows still fits the per-block budget.
    col_cap = min(n, max_block_elems // sub, 8192)
    cols = 0
    cand = _LANES
    while cand <= col_cap:
        if n % cand == 0:
            cols = cand
        cand += _LANES
    if cols == 0:
        # n not 128-divisible (or < 128): one full-extent block (always legal).
        # TODO(synk): tile the leading axis for huge non-128-divisible inputs.
        return 1, n, 1, 1
    rows = n // cols
    rows_budget = max(1, max_block_elems // cols)
    if rows <= rows_budget:
        tile_rows = rows                      # whole array in a single block
    else:
        tile_rows = max(sub, (rows_budget // sub) * sub)
    grid_rows = pl.cdiv(rows, tile_rows)      # ragged last block is masked
    return rows, cols, tile_rows, grid_rows


def identity_pallas_copy(x, *, max_block_bytes=4 << 20, vmem_limit_bytes=48 << 20):
    """Materializing identity: copy x into a fresh buffer with a Pallas kernel."""
    orig_shape, dtype = x.shape, x.dtype
    n = x.size
    if n == 0:
        return x

    itemsize = jnp.dtype(dtype).itemsize
    sub = _sublane_multiple(dtype)
    max_block_elems = max(max_block_bytes // itemsize, _LANES * sub)

    rows, cols, tile_rows, grid_rows = _choose_layout(n, sub, max_block_elems)
    x2 = x.reshape(rows, cols)                # metadata-only for contiguous arrays

    out = pl.pallas_call(
        _copy_kernel,
        out_shape=jax.ShapeDtypeStruct((rows, cols), dtype),
        grid=(grid_rows,),
        in_specs=[pl.BlockSpec((tile_rows, cols), lambda i: (i, 0))],
        out_specs=pl.BlockSpec((tile_rows, cols), lambda i: (i, 0)),
        compiler_params=pltpu.CompilerParams(
            dimension_semantics=("parallel",),
            vmem_limit_bytes=vmem_limit_bytes,
        ),
        cost_estimate=pl.CostEstimate(
            flops=0, transcendentals=0, bytes_accessed=2 * n * itemsize),
    )(x2)
    return out.reshape(orig_shape)


def identity(x, *, materialize=False):
    """Identity.forward: return x.

    The fastest kernel is no kernel -- y = x is free (zero HBM traffic).
    Pass materialize=True only if a distinct output buffer is required; that
    path runs the large-tile Pallas copy kernel above.
    """
    if not materialize:
        return x
    return identity_pallas_copy(x)


if __name__ == "__main__":
    key = jax.random.PRNGKey(0)

    # Primary example consistent with typical GAT feature tensors.
    x = jax.random.normal(key, (2, 4, 16, 16), dtype=jnp.float32)

    # 1) True identity: no kernel at all (the production-fast path).
    y0 = identity(x)
    assert y0 is x

    # 2) Pallas copy kernel: whole array in one lane-dense block.
    y1 = identity(x, materialize=True)
    jax.block_until_ready(y1)
    assert y1.shape == x.shape and y1.dtype == x.dtype
    assert bool(jnp.all(y1 == x))

    # 3) Exercise the multi-step grid + ragged trailing block path
    #    (force small blocks so grid_rows > 1 even at a small shape).
    xb = jax.random.normal(jax.random.PRNGKey(1), (64, 640), dtype=jnp.float32)
    yb = identity_pallas_copy(xb, max_block_bytes=64 * 1024)
    jax.block_until_ready(yb)
    assert bool(jnp.all(yb == xb))

    # 4) Exercise dtype-aware sublane alignment (bf16) and a non-128-divisible
    #    fallback (single full-extent block, no padding).
    xc = jax.random.normal(jax.random.PRNGKey(2), (4, 8, 48)).astype(jnp.bfloat16)
    yc = identity_pallas_copy(xc)
    xd = jax.random.normal(jax.random.PRNGKey(3), (3, 5), dtype=jnp.float32)
    yd = identity_pallas_copy(xd)
    jax.block_until_ready((yc, yd))
    assert bool(jnp.all(yc == xc)) and bool(jnp.all(yd == xd))

    print("KERNEL_OK")
</pallas_src>

<mosaic_0001>
module attributes {stable_mosaic.version = 11 : i64} {
  func.func @_copy_kernel(%arg0: i32, %arg1: memref<1x2048xf32, #tpu.memory_space<vmem>>, %arg2: memref<1x2048xf32, #tpu.memory_space<vmem>>) attributes {dimension_semantics = [#tpu.dimension_semantics<parallel>], iteration_bounds = array<i64: 1>, scalar_prefetch = 0 : i64, scratch_operands = 0 : i64, tpu.core_type = #tpu.core_type<tc>, window_params = [{transform_indices = @transform_0, window_bounds = array<i64: 1, 2048>}, {transform_indices = @transform_1, window_bounds = array<i64: 1, 2048>}]} {
    %c0 = arith.constant 0 : index
    %c0_0 = arith.constant 0 : index
    %0 = vector.load %arg1[%c0, %c0_0] : memref<1x2048xf32, #tpu.memory_space<vmem>>, vector<1x2048xf32>
    %c0_1 = arith.constant 0 : index
    %c0_2 = arith.constant 0 : index
    %1 = vector.load %arg2[%c0_1, %c0_2] : memref<1x2048xf32, #tpu.memory_space<vmem>>, vector<1x2048xf32>
    tpu.vector_store %arg2[%c0_1, %c0_2], %0 {strides = array<i32>} : memref<1x2048xf32, #tpu.memory_space<vmem>>, vector<1x2048xf32>,
    return
  }
  func.func @transform_0(%arg0: i32) -> (i32, i32) {
    %c0_i32 = arith.constant 0 : i32
    %c0_i32_0 = arith.constant 0 : i32
    return %arg0, %c0_i32 : i32, i32
  }
  func.func @transform_1(%arg0: i32) -> (i32, i32) {
    %c0_i32 = arith.constant 0 : i32
    %c0_i32_0 = arith.constant 0 : i32
    return %arg0, %c0_i32 : i32, i32
  }
}

</mosaic_0001>

<bundles_post_ra>
// kernel: tpu_custom_call.1
= control target key start
LH: loop header
LB: loop body
LE: loop exit
PB: predicated region body
PF: predicated region fallthrough
CT: control target
= control target key end

     0   :  { %6 = vsyncpa [#allocation3], 0  ;;  %s104_s0 = inlined_call_operand.hbm [shape: f32[1,2048], index: 0, kind: input, shape index: {}]   ;;  %s105_s1 = inlined_call_operand.hbm [shape: f32[1,2048], index: 1, kind: output, shape index: {}]  }
   0x1   :  { %7 = vsyncpa [#allocation4], 0  ;;  %s86_s6 = smov [#allocation2]  }
   0x2   :  { %s14_s7 = sshll.u32 %s86_s6, 4  ;;  %s15_s7 = int_to_ptr.vmem [resolvable:$true] %s14_s7 }
   0x3   :  { %s50_s8 = scalar_lea.vmem %s15_s7, 256  ;;  %p55_p1 = scmp.lt.s32.totalorder %s15_s7, %s15_s7 }
   0x4   :  { %p51_p0 = scmp.ne.s32.totalorder %s15_s7, %s50_s8  ;;  %p56_p2 = scmp.lt.s32.totalorder %s50_s8, %s50_s8 }
   0x6   :  { %p57_p3 = por %p56_p2, %p55_p1 }
   0x8   :  { %p58_p4 = pnand %p57_p3, %p51_p0 }
   0xa   :  { %61 = shalt.err (!%p58_p4)
}
   0xb   :  { %17 = dma.hbm_to_vmem [thread:$0]  %s104_s0, 256, %s15_s7, [#allocation3]  }
   0xc   :  { %82 = dma.done.wait [#allocation3], 256  }
   0xd   :  { %83 = vsyncadd [#allocation3], 4294967040  ;;  %s87_s11 = smov [#allocation5]   ;;  %v21_v0 = vld [vmem:[#allocation2] sm:$0xff]  ;;  %v22_v1 = vld [vmem:[#allocation2 + $0x8] sm:$0xff] }
   0xe   :  { %s31_s12 = sshll.u32 %s87_s11, 4  ;;  %23 = vst [vmem:[#allocation5] sm:$0xff] %v21_v0  ;;  %24 = vst [vmem:[#allocation5 + $0x8] sm:$0xff] %v22_v1  ;;  %s32_s12 = int_to_ptr.vmem [resolvable:$true] %s31_s12 }
   0xf   :  { %s62_s13 = scalar_lea.vmem %s32_s12, 256  ;;  %p67_p6 = scmp.lt.s32.totalorder %s32_s12, %s32_s12 }
  0x10   :  { %p63_p5 = scmp.ne.s32.totalorder %s32_s12, %s62_s13  ;;  %p68_p7 = scmp.lt.s32.totalorder %s62_s13, %s62_s13 }
  0x12   :  { %p69_p8 = por %p68_p7, %p67_p6 }
  0x14   :  { %p70_p9 = pnand %p69_p8, %p63_p5 }
  0x16   :  { %73 = shalt.err (!%p70_p9)
}
  0x17   :  { %34 = dma.vmem_to_hbm [thread:$0]  %s32_s12, 256, %s105_s1, [#allocation4]  }
  0x18   :  { %84 = dma.done.wait [#allocation4], 256  }
  0x19   :  { %85 = vsyncadd [#allocation4], 4294967040 }
  0x1a   :  { %38 = vsyncpa [#allocation3], 1 }
  0x1b   :  { %39 = vsyncpa [#allocation4], 1 }

</bundles_post_ra>
